<compile_context>
chip_gen: v5e
topology: v5e:2x2
jax: 0.10.0
libtpu: 0.0.40
codegen_flags: <defaults>
</compile_context>

<pallas_src>
import jax
import jax.numpy as jnp
from jax.experimental import pallas as pl
from jax.experimental.pallas import tpu as pltpu

STATES = 2
HIDDEN = 100
ACTIONS = 3

HIDDEN_PAD = 128   # lane-dense intermediate (100 -> 128, zero padded, inert)
OUT_PAD = 8        # narrow output tile (3 -> 8); ~16x less HBM writeback vs 128


def mlp_kernel(x_ref, w1_ref, w2_ref, o_ref):
    # x: (BM, STATES)  w1: (STATES, HIDDEN_PAD)  w2: (HIDDEN_PAD, OUT_PAD)
    x = x_ref[...]
    # First layer (K=2): two VPU broadcast-FMAs, no MXU push/drain latency.
    h = x[:, 0:1] * w1_ref[0:1, :] + x[:, 1:2] * w1_ref[1:2, :]
    # Second layer on the MXU: full 128-wide contraction, narrow 8-lane result.
    o_ref[...] = jnp.dot(h, w2_ref[...],
                         preferred_element_type=jnp.float32).astype(o_ref.dtype)


def _round_up(n, m):
    return ((n + m - 1) // m) * m


def _choose_block_b(B):
    """Batch tile: single sublane-aligned tile for small B; for large B use
    big tiles (<=1024) but always >= 2 grid steps so both v7x TCs get work."""
    if B <= 128:
        return _round_up(B, 8)
    return min(1024, _round_up((B + 1) // 2, 8))


def prepare_params(w1, w2):
    """Pad weights ONCE (hoisted out of the per-call path).

    w1: (STATES, HIDDEN), w2: (HIDDEN, ACTIONS) — i.e. transposed PyTorch
    weights, stored (in, out). Zero padding is numerically inert.
    """
    w1_p = jnp.zeros((STATES, HIDDEN_PAD), jnp.float32).at[:, :HIDDEN].set(w1)
    w2_p = jnp.zeros((HIDDEN_PAD, OUT_PAD), jnp.float32).at[:HIDDEN, :ACTIONS].set(w2)
    return w1_p, w2_p


def nn_forward(x, w1_p, w2_p, *, use_pallas=None):
    """x: (B, STATES) f32; w1_p/w2_p from prepare_params(). Returns (B, ACTIONS)."""
    B = x.shape[0]
    if use_pallas is None:
        # At tiny batches the whole net is a few KFLOPs; XLA's fused dot wins.
        use_pallas = B >= 512
    if not use_pallas:
        return ((x @ w1_p) @ w2_p)[:, :ACTIONS]

    BM = _choose_block_b(B)
    grid = (pl.cdiv(B, BM),)

    out = pl.pallas_call(
        mlp_kernel,
        out_shape=jax.ShapeDtypeStruct((B, OUT_PAD), jnp.float32),
        grid=grid,
        in_specs=[
            # Ragged last batch block is masked by Pallas; no manual x pad.
            pl.BlockSpec((BM, STATES), lambda i: (i, 0)),
            # Weights: same block every grid step -> stay VMEM-resident.
            pl.BlockSpec((STATES, HIDDEN_PAD), lambda i: (0, 0)),
            pl.BlockSpec((HIDDEN_PAD, OUT_PAD), lambda i: (0, 0)),
        ],
        out_specs=pl.BlockSpec((BM, OUT_PAD), lambda i: (i, 0)),
        compiler_params=pltpu.CompilerParams(
            dimension_semantics=("parallel",)),
    )(x, w1_p, w2_p)

    return out[:, :ACTIONS]


def init_params(key):
    # Matches nn.Linear default init: U(-1/sqrt(fan_in), 1/sqrt(fan_in)), no bias.
    # PyTorch weights are (out, in); we store the transposed (in, out) form.
    k1, k2 = jax.random.split(key)
    b1 = 1.0 / jnp.sqrt(STATES)
    b2 = 1.0 / jnp.sqrt(HIDDEN)
    w1 = jax.random.uniform(k1, (STATES, HIDDEN), jnp.float32, -b1, b1)
    w2 = jax.random.uniform(k2, (HIDDEN, ACTIONS), jnp.float32, -b2, b2)
    return w1, w2


if __name__ == "__main__":
    key = jax.random.PRNGKey(0)
    kx, kx2, kp = jax.random.split(key, 3)
    w1, w2 = init_params(kp)
    w1_p, w2_p = prepare_params(w1, w2)

    # Small batch, forcing the Pallas path (single grid step).
    B = 8
    x = jax.random.normal(kx, (B, STATES), jnp.float32)
    out = nn_forward(x, w1_p, w2_p, use_pallas=True)
    jax.block_until_ready(out)
    ref = (x @ w1) @ w2
    assert out.shape == (B, ACTIONS)
    assert jnp.allclose(out, ref, atol=1e-5, rtol=1e-5)

    # Larger (ragged) batch: multi-step parallel grid + masked last block.
    B2 = 1000
    x2 = jax.random.normal(kx2, (B2, STATES), jnp.float32)
    out2 = nn_forward(x2, w1_p, w2_p, use_pallas=True)
    jax.block_until_ready(out2)
    ref2 = (x2 @ w1) @ w2
    assert out2.shape == (B2, ACTIONS)
    assert jnp.allclose(out2, ref2, atol=1e-5, rtol=1e-5)

    print("KERNEL_OK")
</pallas_src>

<mosaic_0001>
module attributes {stable_mosaic.version = 11 : i64} {
  func.func @mlp_kernel(%arg0: i32, %arg1: memref<8x2xf32, #tpu.memory_space<vmem>>, %arg2: memref<2x128xf32, #tpu.memory_space<vmem>>, %arg3: memref<128x8xf32, #tpu.memory_space<vmem>>, %arg4: memref<8x8xf32, #tpu.memory_space<vmem>>) attributes {dimension_semantics = [#tpu.dimension_semantics<parallel>], iteration_bounds = array<i64: 1>, scalar_prefetch = 0 : i64, scratch_operands = 0 : i64, tpu.core_type = #tpu.core_type<tc>, window_params = [{transform_indices = @transform_0, window_bounds = array<i64: 8, 2>}, {pipeline_mode = #tpu.pipeline_mode<synchronous>, transform_indices = @transform_1, window_bounds = array<i64: 2, 128>}, {pipeline_mode = #tpu.pipeline_mode<synchronous>, transform_indices = @transform_2, window_bounds = array<i64: 128, 8>}, {transform_indices = @transform_3, window_bounds = array<i64: 8, 8>}]} {
    %c0 = arith.constant 0 : index
    %c0_0 = arith.constant 0 : index
    %0 = vector.load %arg1[%c0, %c0_0] : memref<8x2xf32, #tpu.memory_space<vmem>>, vector<8x2xf32>
    %1 = vector.extract_strided_slice %0 {offsets = [0, 0], sizes = [8, 1], strides = [1, 1]} : vector<8x2xf32> to vector<8x1xf32>
    %c0_1 = arith.constant 0 : index
    %c0_2 = arith.constant 0 : index
    %2 = vector.load %arg2[%c0_1, %c0_2] : memref<2x128xf32, #tpu.memory_space<vmem>>, vector<1x128xf32>
    %3 = vector.broadcast %1 : vector<8x1xf32> to vector<8x128xf32>
    %4 = vector.broadcast %2 : vector<1x128xf32> to vector<8x128xf32>
    %5 = arith.mulf %3, %4 : vector<8x128xf32>
    %6 = vector.extract_strided_slice %0 {offsets = [0, 1], sizes = [8, 1], strides = [1, 1]} : vector<8x2xf32> to vector<8x1xf32>
    %c1 = arith.constant 1 : index
    %c0_3 = arith.constant 0 : index
    %7 = vector.load %arg2[%c1, %c0_3] : memref<2x128xf32, #tpu.memory_space<vmem>>, vector<1x128xf32>
    %8 = vector.broadcast %6 : vector<8x1xf32> to vector<8x128xf32>
    %9 = vector.broadcast %7 : vector<1x128xf32> to vector<8x128xf32>
    %10 = arith.mulf %8, %9 : vector<8x128xf32>
    %11 = arith.addf %5, %10 : vector<8x128xf32>
    %c0_4 = arith.constant 0 : index
    %c0_5 = arith.constant 0 : index
    %12 = vector.load %arg3[%c0_4, %c0_5] : memref<128x8xf32, #tpu.memory_space<vmem>>, vector<128x8xf32>
    %cst = arith.constant dense<0.000000e+00> : vector<8x8xf32>
    %13 = tpu.matmul %11, %12, %cst {dimension_numbers = #tpu.dot_dimension_numbers<[1], [0], [0], [1], [0, 0, 1, 1], [], []>} : vector<8x128xf32>, vector<128x8xf32>, vector<8x8xf32> -> vector<8x8xf32>
    %c0_6 = arith.constant 0 : index
    %c0_7 = arith.constant 0 : index
    %14 = vector.load %arg4[%c0_6, %c0_7] : memref<8x8xf32, #tpu.memory_space<vmem>>, vector<8x8xf32>
    tpu.vector_store %arg4[%c0_6, %c0_7], %13 {strides = array<i32>} : memref<8x8xf32, #tpu.memory_space<vmem>>, vector<8x8xf32>,
    return
  }
  func.func @transform_0(%arg0: i32) -> (i32, i32) {
    %c0_i32 = arith.constant 0 : i32
    %c0_i32_0 = arith.constant 0 : i32
    return %arg0, %c0_i32 : i32, i32
  }
  func.func @transform_1(%arg0: i32) -> (i32, i32) {
    %c0_i32 = arith.constant 0 : i32
    %c0_i32_0 = arith.constant 0 : i32
    %c0_i32_1 = arith.constant 0 : i32
    return %c0_i32, %c0_i32_0 : i32, i32
  }
  func.func @transform_2(%arg0: i32) -> (i32, i32) {
    %c0_i32 = arith.constant 0 : i32
    %c0_i32_0 = arith.constant 0 : i32
    %c0_i32_1 = arith.constant 0 : i32
    return %c0_i32, %c0_i32_0 : i32, i32
  }
  func.func @transform_3(%arg0: i32) -> (i32, i32) {
    %c0_i32 = arith.constant 0 : i32
    %c0_i32_0 = arith.constant 0 : i32
    return %arg0, %c0_i32 : i32, i32
  }
}

</mosaic_0001>

<bundles_post_ra>
// kernel: tpu_custom_call.1
= control target key start
LH: loop header
LB: loop body
LE: loop exit
PB: predicated region body
PF: predicated region fallthrough
CT: control target
= control target key end

     0   :  { %v119_v3 = vmov 0   ;;  %s202_s0 = inlined_call_operand.vmem [shape: f32[8,2], index: 0, kind: input, shape index: {}]   ;;  %s203_s1 = inlined_call_operand.vmem [shape: f32[2,128], index: 1, kind: input, shape index: {}]   ;;  %s204_s2 = inlined_call_operand.vmem [shape: f32[128,8], index: 2, kind: input, shape index: {}]   ;;  %s205_s3 = inlined_call_operand.hbm [shape: f32[8,8], index: 3, kind: output, shape index: {}]  }
   0x1   :  { %v15_v0 = vld [vmem:[%s202_s0] sm:$0xff]  ;;  %v47_v1 = vld [vmem:[%s204_s2 + $0x78] sm:$0xff]  ;;  %v46_v2 = vld [vmem:[%s204_s2 + $0x70] sm:$0xff]  ;;  %89 = vset.pattern.permute.xlu0 %v119_v3 }
   0x2   :  { %48 = vmatpush.msra.mxu0 %v47_v1  ;;  %19 = vperm.xlu0 %89, %v15_v0   ;;  %v45_v4 = vld [vmem:[%s204_s2 + $0x68] sm:$0xff]  ;;  %v44_v5 = vld [vmem:[%s204_s2 + $0x60] sm:$0xff] }
   0x4   :  { %49 = vmatpush.msra.mxu0 %v46_v2 }
   0x5   :  { %8 = vsyncpa [#allocation3], 0  ;;  %v43_v6 = vld [vmem:[%s204_s2 + $0x58] sm:$0xff]  ;;  %v42_v7 = vld [vmem:[%s204_s2 + $0x50] sm:$0xff]  ;;  %v120_v8 = vmov 1   ;;  %s121_s0 = smov [#allocation2]  }
   0x6   :  { %50 = vmatpush.msra.mxu0 %v45_v4  ;;  %v41_v9 = vld [vmem:[%s204_s2 + $0x48] sm:$0xff]  ;;  %v40_v10 = vld [vmem:[%s204_s2 + $0x40] sm:$0xff]  ;;  %v39_v11 = vld [vmem:[%s204_s2 + $0x38] sm:$0xff]  ;;  %s75_s22 = sshll.u32 %s121_s0, 4  ;;  %s77_s24 = sshll.u32 %s205_s3, 4  ;;  %vm68_vm0 = vcmask 64512   ;;  %s76_s22 = int_to_ptr.vmem [resolvable:$true] %s75_s22  ;;  %s78_s24 = int_to_ptr.hbm [resolvable:$true] %s77_s24 }
   0x7   :  { %v38_v12 = vld [vmem:[%s204_s2 + $0x30] sm:$0xff]  ;;  %v37_v13 = vld [vmem:[%s204_s2 + $0x28] sm:$0xff]  ;;  %v36_v14 = vld [vmem:[%s204_s2 + $0x20] sm:$0xff] }
   0x8   :  { %51 = vmatpush.msra.mxu0 %v44_v5  ;;  %v35_v15 = vld [vmem:[%s204_s2 + $0x18] sm:$0xff]  ;;  %v34_v16 = vld [vmem:[%s204_s2 + $0x10] sm:$0xff]  ;;  %v33_v17 = vld [vmem:[%s204_s2 + $0x8] sm:$0xff] }
   0x9   :  { %v32_v18 = vld [vmem:[%s204_s2] sm:$0xff] }
   0xa   :  { %52 = vmatpush.msra.mxu0 %v43_v6  ;;  %90 = vset.pattern.permute.xlu0 %v120_v8  ;;  %v91_v20 = vld [vmem:[%s203_s1] ss:$0 sm:$0xff]  ;;  %v92_v21 = vld [vmem:[%s203_s1 + $0x1] ss:$0 sm:$0xff] }
   0xb   :  { %26 = vperm.xlu0 %90, %v15_v0  }
   0xc   :  { %53 = vmatpush.msra.mxu0 %v42_v7 }
   0xe   :  { %54 = vmatpush.msra.mxu0 %v41_v9 }
  0x10   :  { %55 = vmatpush.msra.mxu0 %v40_v10 }
  0x12   :  { %56 = vmatpush.msra.mxu0 %v39_v11 }
  0x14   :  { %57 = vmatpush.msra.mxu0 %v38_v12 }
  0x16   :  { %58 = vmatpush.msra.mxu0 %v37_v13 }
  0x18   :  { %59 = vmatpush.msra.mxu0 %v36_v14 }
  0x1a   :  { %60 = vmatpush.msra.mxu0 %v35_v15 }
  0x1c   :  { %61 = vmatpush.msra.mxu0 %v34_v16 }
  0x1e   :  { %62 = vmatpush.msra.mxu0 %v33_v17 }
  0x20   :  { %63 = vmatpush.msra.mxu0 %v32_v18 }
  0x74   :  { %v20_v19 = vpop.permute.xlu0 %19 }
  0x75   :  { %v23_v23 = vmul.f32 %v91_v20, %v20_v19 }
  0x7d   :  { %v27_v22 = vpop.permute.xlu0 %26 }
  0x7e   :  { %v30_v24 = vmul.f32 %v92_v21, %v27_v22 }
  0x80   :  { %v31_v25 = vadd.f32 %v30_v24, %v23_v23 }
  0x82   :  { %64 = vmatmul.f32.vlgmr.msra.gmra.mxu0 %v31_v25 }
  0xff   :  { %v65_v26 = vpop.f32.mrf.mxu0 }
 0x100   :  { %69 = vst.msk [vmem:[#allocation2] sm:$0xff] %vm68_vm0, %v65_v26 }
 0x101   :  { %80 = dma.vmem_to_hbm [thread:$0]  %s76_s22, 128, %s78_s24, [#allocation3]  }
 0x102   :  { %117 = dma.done.wait [#allocation3], 128  }
 0x103   :  { %118 = vsyncadd [#allocation3], 4294967168 }
 0x104   :  { %85 = vsyncpa [#allocation3], 1 }

</bundles_post_ra>
